<compile_context>
chip_gen: v6e
topology: v6e:2x2x1
jax: 0.10.0
libtpu: 0.0.40
codegen_flags: <defaults>
</compile_context>

<pallas_src>
import jax
import jax.numpy as jnp
from jax.experimental import pallas as pl
from jax.experimental.pallas import tpu as pltpu


def _decoder_kernel(x_ref, w_ref, b_ref, o_ref):
    x = x_ref[...]                      # (TILE_B, 32) f32, streamed tile
    w = w_ref[...]                      # (1, 32) f32, resident weight row
    b = b_ref[0]                        # scalar bias from SMEM

    # VPU multiply (row-broadcast of w) + XLU lane reduce; no MXU for a K=32 dot.
    z = jnp.sum(x * w, axis=1) + b      # (TILE_B,)
    y = jax.nn.sigmoid(z)               # EUP transcendental

    # Lane-dense store: batch sits on the lane axis of the output tile.
    o_ref[...] = y[None, :].astype(o_ref.dtype)   # (1, TILE_B)


def _round_up(n, m):
    return ((n + m - 1) // m) * m


def output_decoder(x, weight, bias, *, tile_b=8192):
    """sigmoid(x @ weight.T + bias).

    x: (..., 32) f32; weight: (1, 32) f32 (PyTorch nn.Linear layout); bias: (1,) f32.
    Returns (..., 1) f32 (matches the nn.Module forward).
    """
    F = x.shape[-1]
    assert weight.shape == (1, F)
    assert bias.shape == (1,)

    lead = x.shape[:-1]
    x2 = x.reshape(-1, F)               # flatten leading dims like nn.Linear
    B = x2.shape[0]

    # Tile must be a multiple of 128 (lane-dense output) and of 8 (sublane align).
    tile = max(128, min(_round_up(tile_b, 128), _round_up(B, 128)))
    Bp = _round_up(B, tile)
    if Bp != B:
        x2 = jnp.pad(x2, ((0, Bp - B), (0, 0)))
    n_tiles = Bp // tile

    out = pl.pallas_call(
        _decoder_kernel,
        out_shape=jax.ShapeDtypeStruct((1, Bp), jnp.float32),
        grid=(n_tiles,),
        in_specs=[
            # x: (TILE_B, 32) tiles streamed over the batch grid (double-buffered).
            pl.BlockSpec((tile, F), lambda i: (i, 0)),
            # weight: full (1, 32) row, constant block index -> stays VMEM-resident.
            pl.BlockSpec((1, F), lambda i: (0, 0)),
            # bias: single scalar, kept in SMEM.
            pl.BlockSpec(memory_space=pltpu.MemorySpace.SMEM),
        ],
        # Lane-dense output tile: last dim is a multiple of 128 -> unmasked stores.
        out_specs=pl.BlockSpec((1, tile), lambda i: (0, i)),
        compiler_params=pltpu.CompilerParams(
            dimension_semantics=("parallel",),
        ),
    )(x2, weight, bias)

    # Free metadata reshape back to the module's (..., 1) layout; drop batch padding.
    return out.reshape(Bp, 1)[:B].reshape(*lead, 1)


if __name__ == "__main__":
    key = jax.random.PRNGKey(0)
    kx, kw, kb = jax.random.split(key, 3)

    B, F = 8, 32
    x = jax.random.normal(kx, (B, F), dtype=jnp.float32)
    # Deterministic parameter init (mimic nn.Linear uniform(-1/sqrt(32), 1/sqrt(32)))
    bound = 1.0 / (F ** 0.5)
    weight = jax.random.uniform(kw, (1, F), dtype=jnp.float32, minval=-bound, maxval=bound)
    bias = jax.random.uniform(kb, (1,), dtype=jnp.float32, minval=-bound, maxval=bound)

    out = output_decoder(x, weight, bias)
    out = jax.block_until_ready(out)

    # Reference check in plain JAX
    ref = jax.nn.sigmoid(x @ weight.T + bias)
    assert out.shape == (B, 1)
    assert jnp.allclose(out, ref, atol=1e-5, rtol=1e-5)

    print("KERNEL_OK")
</pallas_src>

<mosaic_0001>
module attributes {stable_mosaic.version = 11 : i64} {
  func.func @_decoder_kernel(%arg0: i32, %arg1: memref<128x32xf32, #tpu.memory_space<vmem>>, %arg2: memref<1x32xf32, #tpu.memory_space<vmem>>, %arg3: memref<1xf32, #tpu.memory_space<smem>>, %arg4: memref<1x128xf32, #tpu.memory_space<vmem>>) attributes {dimension_semantics = [#tpu.dimension_semantics<parallel>], iteration_bounds = array<i64: 1>, scalar_prefetch = 0 : i64, scratch_operands = 0 : i64, tpu.core_type = #tpu.core_type<tc>, window_params = [{transform_indices = @transform_0, window_bounds = array<i64: 128, 32>}, {pipeline_mode = #tpu.pipeline_mode<synchronous>, transform_indices = @transform_1, window_bounds = array<i64: 1, 32>}, {transform_indices = @transform_2, window_bounds = array<i64: 1>}, {transform_indices = @transform_3, window_bounds = array<i64: 1, 128>}]} {
    %c0 = arith.constant 0 : index
    %c0_0 = arith.constant 0 : index
    %0 = vector.load %arg1[%c0, %c0_0] : memref<128x32xf32, #tpu.memory_space<vmem>>, vector<128x32xf32>
    %c0_1 = arith.constant 0 : index
    %c0_2 = arith.constant 0 : index
    %1 = vector.load %arg2[%c0_1, %c0_2] : memref<1x32xf32, #tpu.memory_space<vmem>>, vector<1x32xf32>
    %c0_3 = arith.constant 0 : index
    %2 = memref.load %arg3[%c0_3] : memref<1xf32, #tpu.memory_space<smem>>
    %3 = vector.broadcast %1 : vector<1x32xf32> to vector<128x32xf32>
    %4 = arith.mulf %0, %3 : vector<128x32xf32>
    %cst = arith.constant dense<0.000000e+00> : vector<128xf32>
    %5 = vector.multi_reduction <add>, %4, %cst [1] : vector<128x32xf32> to vector<128xf32>
    %6 = vector.broadcast %2 : f32 to vector<128xf32>
    %7 = arith.addf %5, %6 : vector<128xf32>
    %8 = arith.negf %7 : vector<128xf32>
    %9 = math.exp %8 : vector<128xf32>
    %cst_4 = arith.constant 1.000000e+00 : f32
    %10 = vector.broadcast %cst_4 : f32 to vector<128xf32>
    %11 = arith.addf %10, %9 : vector<128xf32>
    %12 = arith.divf %10, %11 : vector<128xf32>
    %13 = vector.shape_cast %12 : vector<128xf32> to vector<1x128xf32>
    %c0_5 = arith.constant 0 : index
    %c0_6 = arith.constant 0 : index
    %14 = vector.load %arg4[%c0_5, %c0_6] : memref<1x128xf32, #tpu.memory_space<vmem>>, vector<1x128xf32>
    tpu.vector_store %arg4[%c0_5, %c0_6], %13 {strides = array<i32>} : memref<1x128xf32, #tpu.memory_space<vmem>>, vector<1x128xf32>,
    return
  }
  func.func @transform_0(%arg0: i32) -> (i32, i32) {
    %c0_i32 = arith.constant 0 : i32
    %c0_i32_0 = arith.constant 0 : i32
    return %arg0, %c0_i32 : i32, i32
  }
  func.func @transform_1(%arg0: i32) -> (i32, i32) {
    %c0_i32 = arith.constant 0 : i32
    %c0_i32_0 = arith.constant 0 : i32
    %c0_i32_1 = arith.constant 0 : i32
    return %c0_i32, %c0_i32_0 : i32, i32
  }
  func.func @transform_2(%arg0: i32) -> i32 {
    %c0_i32 = arith.constant 0 : i32
    %c0_i32_0 = arith.constant 0 : i32
    return %c0_i32 : i32
  }
  func.func @transform_3(%arg0: i32) -> (i32, i32) {
    %c0_i32 = arith.constant 0 : i32
    %c0_i32_0 = arith.constant 0 : i32
    return %c0_i32, %arg0 : i32, i32
  }
}

</mosaic_0001>

<bundles_post_ra>
// kernel: tpu_custom_call.1
= control target key start
LH: loop header
LB: loop body
LE: loop exit
PB: predicated region body
PF: predicated region fallthrough
CT: control target
= control target key end

     0   :  { %vm56_vm0 = vcmask 261120   ;;  %s615_s0 = inlined_call_operand.vmem [shape: f32[128,32], index: 0, kind: input, shape index: {}]   ;;  %s616_s1 = inlined_call_operand.vmem [shape: f32[1,32], index: 1, kind: input, shape index: {}]   ;;  %s617_s2 = inlined_call_operand.<no memory space> [shape: f32[1], index: 2, kind: input, shape index: {}]   ;;  %s618_s3 = inlined_call_operand.hbm [shape: f32[1,128], index: 3, kind: output, shape index: {}]  }
   0x1   :  { %v16_v0 = vld [vmem:[%s615_s0] sm:$0xff]  ;;  %v18_v2 = vld [vmem:[%s615_s0 + $0x10] sm:$0xff]  ;;  %v17_v5 = vld [vmem:[%s615_s0 + $0x8] sm:$0xff] }
   0x2   :  { %v361_v1 = vld [vmem:[%s616_s1] ss:$0 sm:$0xff]  ;;  %v19_v6 = vld [vmem:[%s615_s0 + $0x18] sm:$0xff]  ;;  %v21_v10 = vld [vmem:[%s615_s0 + $0x28] sm:$0xff] }
   0x3   :  { %v40_v3 = vmul.f32 %v361_v1, %v16_v0  ;;  %v42_v4 = vmul.f32 %v361_v1, %v18_v2  ;;  %v41_v7 = vmul.f32 %v361_v1, %v17_v5  ;;  %v43_v8 = vmul.f32 %v361_v1, %v19_v6  ;;  %v20_v9 = vld [vmem:[%s615_s0 + $0x20] sm:$0xff] }
   0x4   :  { %v44_v15 = vmul.f32 %v361_v1, %v20_v9  ;;  %v45_v16 = vmul.f32 %v361_v1, %v21_v10 }
   0x5   :  { %v57_v11 = vsel %vm56_vm0, %v40_v3, 0.0  ;;  %v63_v12 = vsel %vm56_vm0, %v42_v4, 0.0  ;;  %v60_v13 = vsel %vm56_vm0, %v41_v7, 0.0  ;;  %v66_v14 = vsel %vm56_vm0, %v43_v8, 0.0 }
   0x6   :  { %58 = vadd.xlane.f32.xlu0 %v57_v11  ;;  %64 = vadd.xlane.f32.xlu1 %v63_v12 }
   0x7   :  { %9 = vsyncpa [#allocation4], 0  ;;  %v22_v17 = vld [vmem:[%s615_s0 + $0x30] sm:$0xff]  ;;  %v23_v18 = vld [vmem:[%s615_s0 + $0x38] sm:$0xff]  ;;  %v69_v19 = vsel %vm56_vm0, %v44_v15, 0.0  ;;  %v72_v20 = vsel %vm56_vm0, %v45_v16, 0.0  ;;  %v556_v49 = vstv %s617_s2 }
   0x8   :  { %v46_v21 = vmul.f32 %v361_v1, %v22_v17  ;;  %v47_v22 = vmul.f32 %v361_v1, %v23_v18  ;;  %v24_v23 = vld [vmem:[%s615_s0 + $0x40] sm:$0xff]  ;;  %v25_v24 = vld [vmem:[%s615_s0 + $0x48] sm:$0xff]  ;;  %v26_v29 = vld [vmem:[%s615_s0 + $0x50] sm:$0xff]  ;;  %vm245_vm1 = vcmask 130112   ;;  %vm252_vm2 = vcmask 195712  }
   0x9   :  { %v48_v27 = vmul.f32 %v361_v1, %v24_v23  ;;  %v49_v28 = vmul.f32 %v361_v1, %v25_v24  ;;  %v27_v30 = vld [vmem:[%s615_s0 + $0x58] sm:$0xff]  ;;  %v50_v33 = vmul.f32 %v361_v1, %v26_v29  ;;  %v28_v35 = vld [vmem:[%s615_s0 + $0x60] sm:$0xff]  ;;  %v29_v36 = vld [vmem:[%s615_s0 + $0x68] sm:$0xff]  ;;  %vm259_vm3 = vcmask 261312  }
   0xa   :  { %61 = vadd.xlane.f32.xlu0 %v60_v13  ;;  %67 = vadd.xlane.f32.xlu1 %v66_v14  ;;  %v75_v25 = vsel %vm56_vm0, %v46_v21, 0.0  ;;  %v78_v26 = vsel %vm56_vm0, %v47_v22, 0.0  ;;  %v51_v34 = vmul.f32 %v361_v1, %v27_v30  ;;  %v52_v39 = vmul.f32 %v361_v1, %v28_v35  ;;  %v30_v41 = vld [vmem:[%s615_s0 + $0x70] sm:$0xff]  ;;  %v31_v42 = vld [vmem:[%s615_s0 + $0x78] sm:$0xff]  ;;  %s465_s0 = smov [#allocation3]  }
   0xb   :  { %v81_v31 = vsel %vm56_vm0, %v48_v27, 0.0  ;;  %v84_v32 = vsel %vm56_vm0, %v49_v28, 0.0  ;;  %v87_v37 = vsel %vm56_vm0, %v50_v33, 0.0  ;;  %v53_v40 = vmul.f32 %v361_v1, %v29_v36  ;;  %s353_s2 = sshll.u32 %s465_s0, 4  ;;  %s354_s2 = int_to_ptr.vmem [resolvable:$true] %s353_s2 }
   0xc   :  { %v90_v38 = vsel %vm56_vm0, %v51_v34, 0.0  ;;  %v93_v43 = vsel %vm56_vm0, %v52_v39, 0.0  ;;  %v54_v45 = vmul.f32 %v361_v1, %v30_v41  ;;  %v55_v46 = vmul.f32 %v361_v1, %v31_v42  ;;  %s443_s20 = scalar_lea.vmem %s354_s2, 16  ;;  %s447_s21 = scalar_lea.vmem %s354_s2, 32 }
   0xd   :  { %v96_v44 = vsel %vm56_vm0, %v53_v40, 0.0  ;;  %vm266_vm4 = vcmask 326912   ;;  %vm273_vm5 = vcmask 392512   ;;  %vm280_vm6 = vcmask 458112   ;;  %p444_p0 = scmp.ne.s32.totalorder %s354_s2, %s443_s20  ;;  %p448_p1 = scmp.lt.s32.totalorder %s354_s2, %s354_s2 }
   0xe   :  { %70 = vadd.xlane.f32.xlu0 %v69_v19  ;;  %73 = vadd.xlane.f32.xlu1 %v72_v20  ;;  %v99_v47 = vsel %vm56_vm0, %v54_v45, 0.0  ;;  %v102_v48 = vsel %vm56_vm0, %v55_v46, 0.0  ;;  %vm287_vm7 = vcmask 523712   ;;  %vm294_vm8 = vcmask 589312   ;;  %p449_p2 = scmp.lt.s32.totalorder %s447_s21, %s443_s20 }
   0xf   :  { %vm301_vm9 = vcmask 654912   ;;  %vm308_vm10 = vcmask 720512   ;;  %vm315_vm11 = vcmask 786112   ;;  %vm322_vm12 = vcmask 851712  }
  0x10   :  { %vm329_vm13 = vcmask 917312   ;;  %vm336_vm14 = vcmask 982912   ;;  %vm343_vm15 = vcmask 1048512   ;;  %p450_p3 = por %p449_p2, %p448_p1 }
  0x12   :  { %76 = vadd.xlane.f32.xlu0 %v75_v25  ;;  %79 = vadd.xlane.f32.xlu1 %v78_v26  ;;  %v234_v25 = vlaneseq  ;;  %p451_p4 = pnand %p450_p3, %p444_p0 }
  0x14   :  { %v572_v36 = vand.u32 127, %v234_v25 }
  0x16   :  { %82 = vadd.xlane.f32.xlu0 %v81_v31  ;;  %85 = vadd.xlane.f32.xlu1 %v84_v32 }
  0x1a   :  { %88 = vadd.xlane.f32.xlu0 %v87_v37  ;;  %91 = vadd.xlane.f32.xlu1 %v90_v38 }
  0x1e   :  { %94 = vadd.xlane.f32.xlu0 %v93_v43  ;;  %97 = vadd.xlane.f32.xlu1 %v96_v44 }
  0x22   :  { %100 = vadd.xlane.f32.xlu0 %v99_v47  ;;  %103 = vadd.xlane.f32.xlu1 %v102_v48  ;;  %v576_v47 = vshrl.u32 %v234_v25, 7  ;;  %v247_v48 = vadd.s32 4294967280, %v572_v36 }
  0x8f   :  { %v59_v50 = vpop.xlane.xlu0 %58  ;;  %v65_v51 = vpop.xlane.xlu1 %64 }
  0x90   :  { %v106_v52 = vadd.f32 %v556_v49, %v59_v50  ;;  %v108_v53 = vadd.f32 %v556_v49, %v65_v51  ;;  %v240_v51 = vadd.s32 4294967288, %v572_v36 }
  0x92   :  { %v362_v54 = vmul.f32 -1.442695, %v106_v52  ;;  %v364_v55 = vmul.f32 -1.442695, %v108_v53 }
  0x93   :  { %v62_v56 = vpop.xlane.xlu0 %61  ;;  %v68_v57 = vpop.xlane.xlu1 %67 }
  0x94   :  { %379 = vpow2.f32 %v362_v54  ;;  %v107_v58 = vadd.f32 %v556_v49, %v62_v56  ;;  %v109_v59 = vadd.f32 %v556_v49, %v68_v57  ;;  %v254_v54 = vadd.s32 4294967272, %v572_v36 }
  0x95   :  { %381 = vpow2.f32 %v364_v55 }
  0x96   :  { %v363_v60 = vmul.f32 -1.442695, %v107_v58  ;;  %v365_v61 = vmul.f32 -1.442695, %v109_v59  ;;  %v238_v59 = vsub.s32 %v572_v36, %v576_v47 }
  0x97   :  { %v71_v62 = vpop.xlane.xlu0 %70  ;;  %v74_v63 = vpop.xlane.xlu1 %73 }
  0x98   :  { %383 = vpow2.f32 %v363_v60  ;;  %v110_v0 = vadd.f32 %v556_v49, %v71_v62  ;;  %v111_v1 = vadd.f32 %v556_v49, %v74_v63  ;;  %v243_v60 = vsub.s32 %v240_v51, %v576_v47 }
  0x99   :  { %385 = vpow2.f32 %v365_v61  ;;  %v250_v62 = vsub.s32 %v247_v48, %v576_v47  ;;  %v257_v63 = vsub.s32 %v254_v54, %v576_v47  ;;  %v310_v48 = vadd.s32 4294967208, %v572_v36 }
  0x9a   :  { %v366_v2 = vmul.f32 -1.442695, %v110_v0  ;;  %v367_v3 = vmul.f32 -1.442695, %v111_v1 }
  0x9b   :  { %v77_v4 = vpop.xlane.xlu0 %76  ;;  %v80_v5 = vpop.xlane.xlu1 %79 }
  0x9c   :  { %387 = vpow2.f32 %v366_v2  ;;  %v112_v6 = vadd.f32 %v556_v49, %v77_v4  ;;  %v113_v7 = vadd.f32 %v556_v49, %v80_v5  ;;  %v268_v4 = vadd.s32 4294967256, %v572_v36 }
  0x9d   :  { %389 = vpow2.f32 %v367_v3 }
  0x9e   :  { %v368_v8 = vmul.f32 -1.442695, %v112_v6  ;;  %v369_v9 = vmul.f32 -1.442695, %v113_v7 }
  0x9f   :  { %v83_v10 = vpop.xlane.xlu0 %82  ;;  %v86_v11 = vpop.xlane.xlu1 %85 }
  0xa0   :  { %391 = vpow2.f32 %v368_v8  ;;  %v114_v12 = vadd.f32 %v556_v49, %v83_v10  ;;  %v115_v13 = vadd.f32 %v556_v49, %v86_v11 }
  0xa1   :  { %v380_v14 = vpop.eup %379  ;;  %393 = vpow2.f32 %v369_v9  ;;  %v275_v9 = vadd.s32 4294967248, %v572_v36 }
  0xa2   :  { %v382_v15 = vpop.eup %381  ;;  %v170_v16 = vadd.f32 1.0, %v380_v14  ;;  %v370_v17 = vmul.f32 -1.442695, %v114_v12  ;;  %v371_v19 = vmul.f32 -1.442695, %v115_v13 }
  0xa3   :  { %v172_v18 = vadd.f32 1.0, %v382_v15  ;;  %v89_v20 = vpop.xlane.xlu0 %88  ;;  %v92_v21 = vpop.xlane.xlu1 %91 }
  0xa4   :  { %395 = vrcp.f32 %v170_v16  ;;  %v116_v22 = vadd.f32 %v556_v49, %v89_v20  ;;  %v117_v23 = vadd.f32 %v556_v49, %v92_v21 }
  0xa5   :  { %v384_v24 = vpop.eup %383  ;;  %397 = vrcp.f32 %v172_v18  ;;  %v271_v18 = vsub.s32 %v268_v4, %v576_v47  ;;  %v338_v4 = vadd.s32 4294967176, %v572_v36 }
  0xa6   :  { %v386_v26 = vpop.eup %385  ;;  %v171_v27 = vadd.f32 1.0, %v384_v24  ;;  %399 = vpow2.f32 %v370_v17  ;;  %v372_v28 = vmul.f32 -1.442695, %v116_v22  ;;  %v373_v30 = vmul.f32 -1.442695, %v117_v23 }
  0xa7   :  { %v173_v29 = vadd.f32 1.0, %v386_v26  ;;  %401 = vpow2.f32 %v371_v19  ;;  %v95_v31 = vpop.xlane.xlu0 %94  ;;  %v98_v32 = vpop.xlane.xlu1 %97  ;;  %v282_v19 = vadd.s32 4294967240, %v572_v36  ;;  %v278_v23 = vsub.s32 %v275_v9, %v576_v47 }
  0xa8   :  { %403 = vrcp.f32 %v171_v27  ;;  %v118_v33 = vadd.f32 %v556_v49, %v95_v31  ;;  %v119_v34 = vadd.f32 %v556_v49, %v98_v32  ;;  %v289_v27 = vadd.s32 4294967232, %v572_v36 }
  0xa9   :  { %v388_v35 = vpop.eup %387  ;;  %405 = vrcp.f32 %v173_v29  ;;  %v285_v32 = vsub.s32 %v282_v19, %v576_v47 }
  0xaa   :  { %v390_v37 = vpop.eup %389  ;;  %v174_v38 = vadd.f32 1.0, %v388_v35  ;;  %407 = vpow2.f32 %v372_v28  ;;  %v374_v39 = vmul.f32 -1.442695, %v118_v33  ;;  %v375_v41 = vmul.f32 -1.442695, %v119_v34 }
  0xab   :  { %v175_v40 = vadd.f32 1.0, %v390_v37  ;;  %409 = vpow2.f32 %v373_v30  ;;  %v101_v42 = vpop.xlane.xlu0 %100  ;;  %v104_v43 = vpop.xlane.xlu1 %103  ;;  %v296_v28 = vadd.s32 4294967224, %v572_v36 }
  0xac   :  { %411 = vrcp.f32 %v174_v38  ;;  %v120_v44 = vadd.f32 %v556_v49, %v101_v42  ;;  %v121_v45 = vadd.f32 %v556_v49, %v104_v43  ;;  %v261_v49 = vadd.s32 4294967264, %v572_v36 }
  0xad   :  { %v392_v46 = vpop.eup %391  ;;  %413 = vrcp.f32 %v175_v40  ;;  %v292_v40 = vsub.s32 %v289_v27, %v576_v47  ;;  %v303_v43 = vadd.s32 4294967216, %v572_v36 }
  0xae   :  { %v394_v50 = vpop.eup %393  ;;  %v176_v52 = vadd.f32 1.0, %v392_v46  ;;  %415 = vpow2.f32 %v374_v39  ;;  %v376_v53 = vmul.f32 -1.442695, %v120_v44  ;;  %v377_v56 = vmul.f32 -1.442695, %v121_v45 }
  0xaf   :  { %v177_v55 = vadd.f32 1.0, %v394_v50  ;;  %417 = vpow2.f32 %v375_v41  ;;  %v264_v3 = vsub.s32 %v261_v49, %v576_v47  ;;  %v299_v41 = vsub.s32 %v296_v28, %v576_v47 }
  0xb0   :  { %419 = vrcp.f32 %v176_v52  ;;  %v306_v54 = vsub.s32 %v303_v43, %v576_v47  ;;  %v313_v49 = vsub.s32 %v310_v48, %v576_v47 }
  0xb1   :  { %v396_v57 = vpop.eup %395  ;;  %421 = vrcp.f32 %v177_v55  ;;  %v317_v55 = vadd.s32 4294967200, %v572_v36 }
  0xb2   :  { %v398_v58 = vpop.eup %397  ;;  %423 = vpow2.f32 %v376_v53  ;;  %v239_v7 = vrot.slane %v396_v57, %v238_v59 }
  0xb3   :  { %v400_v61 = vpop.eup %399  ;;  %425 = vpow2.f32 %v377_v56  ;;  %v251_v11 = vrot.slane %v398_v58, %v250_v62  ;;  %v324_v58 = vadd.s32 4294967192, %v572_v36 }
  0xb4   :  { %v402_v0 = vpop.eup %401  ;;  %v178_v1 = vadd.f32 1.0, %v400_v61 }
  0xb5   :  { %v404_v2 = vpop.eup %403  ;;  %v179_v5 = vadd.f32 1.0, %v402_v0  ;;  %v331_v0 = vadd.s32 4294967184, %v572_v36 }
  0xb6   :  { %v406_v6 = vpop.eup %405  ;;  %v244_v8 = vrot.slane %v404_v2, %v243_v60  ;;  %427 = vrcp.f32 %v178_v1 }
  0xb7   :  { %v408_v10 = vpop.eup %407  ;;  %v258_v12 = vrot.slane %v406_v6, %v257_v63  ;;  %429 = vrcp.f32 %v179_v5  ;;  %v320_v63 = vsub.s32 %v317_v55, %v576_v47  ;;  %v334_v9 = vsub.s32 %v331_v0, %v576_v47 }
  0xb8   :  { %v410_v13 = vpop.eup %409  ;;  %v246_v14 = vsel %vm245_vm1, %v244_v8, %v239_v7  ;;  %v180_v15 = vadd.f32 1.0, %v408_v10 }
  0xb9   :  { %v412_v16 = vpop.eup %411  ;;  %v253_v17 = vsel %vm252_vm2, %v251_v11, %v246_v14  ;;  %v181_v20 = vadd.f32 1.0, %v410_v13 }
  0xba   :  { %v414_v21 = vpop.eup %413  ;;  %v265_v22 = vrot.slane %v412_v16, %v264_v3  ;;  %431 = vrcp.f32 %v180_v15  ;;  %v260_v25 = vsel %vm259_vm3, %v258_v12, %v253_v17  ;;  %v327_v3 = vsub.s32 %v324_v58, %v576_v47 }
  0xbb   :  { %v416_v24 = vpop.eup %415  ;;  %433 = vrcp.f32 %v181_v20  ;;  %v272_v31 = vrot.slane %v414_v21, %v271_v18  ;;  %v341_v12 = vsub.s32 %v338_v4, %v576_v47 }
  0xbc   :  { %v418_v26 = vpop.eup %417  ;;  %v182_v29 = vadd.f32 1.0, %v416_v24  ;;  %v267_v35 = vsel %vm266_vm4, %v265_v22, %v260_v25 }
  0xbd   :  { %v420_v30 = vpop.eup %419  ;;  %v183_v33 = vadd.f32 1.0, %v418_v26  ;;  %v274_v44 = vsel %vm273_vm5, %v272_v31, %v267_v35 }
  0xbe   :  { %v422_v34 = vpop.eup %421  ;;  %v279_v37 = vrot.slane %v420_v30, %v278_v23  ;;  %435 = vrcp.f32 %v182_v29 }
  0xbf   :  { %v424_v38 = vpop.eup %423  ;;  %437 = vrcp.f32 %v183_v33  ;;  %v286_v45 = vrot.slane %v422_v34, %v285_v32 }
  0xc0   :  { %v426_v39 = vpop.eup %425  ;;  %v184_v42 = vadd.f32 1.0, %v424_v38  ;;  %v281_v50 = vsel %vm280_vm6, %v279_v37, %v274_v44 }
  0xc1   :  { %v185_v46 = vadd.f32 1.0, %v426_v39  ;;  %v288_v57 = vsel %vm287_vm7, %v286_v45, %v281_v50 }
  0xc2   :  { %439 = vrcp.f32 %v184_v42 }
  0xc3   :  { %v428_v51 = vpop.eup %427  ;;  %441 = vrcp.f32 %v185_v46 }
  0xc4   :  { %v430_v52 = vpop.eup %429  ;;  %v293_v53 = vrot.slane %v428_v51, %v292_v40 }
  0xc5   :  { %v300_v56 = vrot.slane %v430_v52, %v299_v41 }
  0xc6   :  { %v295_v59 = vsel %vm294_vm8, %v293_v53, %v288_v57 }
  0xc7   :  { %v432_v60 = vpop.eup %431  ;;  %v302_v1 = vsel %vm301_vm9, %v300_v56, %v295_v59 }
  0xc8   :  { %v434_v61 = vpop.eup %433  ;;  %v307_v62 = vrot.slane %v432_v60, %v306_v54 }
  0xc9   :  { %v314_v2 = vrot.slane %v434_v61, %v313_v49 }
  0xca   :  { %v309_v5 = vsel %vm308_vm10, %v307_v62, %v302_v1 }
  0xcb   :  { %v436_v6 = vpop.eup %435  ;;  %v316_v10 = vsel %vm315_vm11, %v314_v2, %v309_v5 }
  0xcc   :  { %v438_v7 = vpop.eup %437  ;;  %v321_v8 = vrot.slane %v436_v6, %v320_v63 }
  0xcd   :  { %v328_v11 = vrot.slane %v438_v7, %v327_v3 }
  0xce   :  { %v323_v13 = vsel %vm322_vm12, %v321_v8, %v316_v10 }
  0xcf   :  { %v440_v14 = vpop.eup %439  ;;  %v330_v16 = vsel %vm329_vm13, %v328_v11, %v323_v13 }
  0xd0   :  { %v442_v15 = vpop.eup %441  ;;  %v335_v36 = vrot.slane %v440_v14, %v334_v9 }
  0xd1   :  { %v342_v17 = vrot.slane %v442_v15, %v341_v12 }
  0xd2   :  { %v337_v18 = vsel %vm336_vm14, %v335_v36, %v330_v16 }
  0xd3   :  { %v344_v19 = vsel %vm343_vm15, %v342_v17, %v337_v18 }
  0xd4   :  { %346 = vst [vmem:[#allocation3] sm:$0x1] %v344_v19 }
  0xd5   :  { %454 = shalt.err (!%p451_p4)
}
  0xd6   :  { %356 = dma.vmem_to_hbm [thread:$0]  %s354_s2, 16, %s618_s3, [#allocation4]  }
  0xd7   :  { %463 = dma.done.wait [#allocation4], 16  }
  0xd8   :  { %464 = vsyncadd [#allocation4], 4294967280 }
  0xd9   :  { %360 = vsyncpa [#allocation4], 1 }

</bundles_post_ra>
